<compile_context>
chip_gen: v7x
topology: tpu7x:2x2x1
jax: 0.10.0
libtpu: 0.0.40
codegen_flags: <defaults>
</compile_context>

<pallas_src>
import jax
import jax.numpy as jnp
from jax.experimental import pallas as pl
from jax.experimental.pallas import tpu as pltpu


def _cow_kernel(scale_ref, bias_ref, w_ref, o_ref):
    # scale_ref / bias_ref: (1, 1) f32 scalars in SMEM.
    # w_ref / o_ref: (TM, D) tile in VMEM.
    m = scale_ref[0, 0]
    b1000 = bias_ref[0, 0]
    o_ref[...] = (m * w_ref[...] + b1000).astype(o_ref.dtype)


def _choose_tile_rows(n, d, itemsize, target_bytes=2 << 20):
    """Largest multiple-of-8 row tile with tile_bytes <= target.

    With double buffering (2 input + 2 output buffers) this keeps VMEM use
    around 4 * target_bytes = 8 MiB -> safe on v5e (16 MiB scoped default),
    v6e (32 MiB) and v7x (32 MiB scoped / 64 MiB physical).
    """
    if n * d * itemsize <= target_bytes:
        return n
    tm = (target_bytes // (d * itemsize)) // 8 * 8
    return int(max(8, min(tm, n)))


def cow_predictor(cow_weight: jax.Array, m: jax.Array, b: jax.Array) -> jax.Array:
    """Elementwise affine: m * cow_weight + b * 1000, tiled over rows."""
    orig_shape = cow_weight.shape
    x = cow_weight if cow_weight.ndim == 2 else cow_weight.reshape(-1, orig_shape[-1])
    n, d = x.shape
    itemsize = jnp.dtype(x.dtype).itemsize
    tm = _choose_tile_rows(n, d, itemsize)
    grid = (pl.cdiv(n, tm),)

    # Hoist the constant math out of the kernel: fold * 1000 into the bias once.
    scale = jnp.asarray(m, jnp.float32).reshape(1, 1)
    bias = (jnp.asarray(b, jnp.float32) * 1000.0).reshape(1, 1)

    out = pl.pallas_call(
        _cow_kernel,
        out_shape=jax.ShapeDtypeStruct((n, d), x.dtype),
        grid_spec=pl.GridSpec(
            grid=grid,
            in_specs=[
                pl.BlockSpec(memory_space=pltpu.SMEM),    # m scalar
                pl.BlockSpec(memory_space=pltpu.SMEM),    # b * 1000 scalar
                pl.BlockSpec((tm, d), lambda i: (i, 0)),  # cow_weight row tile
            ],
            out_specs=pl.BlockSpec((tm, d), lambda i: (i, 0)),
        ),
        compiler_params=pltpu.CompilerParams(
            dimension_semantics=("parallel",),  # independent tiles -> both v7x TCs
        ),
        cost_estimate=pl.CostEstimate(
            flops=2 * n * d,
            transcendentals=0,
            bytes_accessed=2 * n * d * itemsize,
        ),
    )(scale, bias, x)

    return out if cow_weight.ndim == 2 else out.reshape(orig_shape)


if __name__ == "__main__":
    key = jax.random.PRNGKey(0)

    # Deterministic parameter init matching CowPredictor.__init__.
    m_param = jnp.float32(2.0)
    b_param = jnp.float32(0.0)

    # --- Small f32 demo: batch of 8 cows x 128 weight features (single tile).
    k0, k1, k2 = jax.random.split(key, 3)
    cow_weight = jax.random.uniform(
        k0, (8, 128), dtype=jnp.float32, minval=100.0, maxval=900.0
    )
    out = jax.block_until_ready(cow_predictor(cow_weight, m_param, b_param))
    ref = m_param * cow_weight + b_param * 1000.0
    assert out.shape == cow_weight.shape and out.dtype == cow_weight.dtype
    assert jnp.allclose(out, ref, rtol=1e-6, atol=1e-6)

    # --- bf16 path: exercises the explicit output-dtype cast.
    cw_bf16 = jax.random.uniform(
        k1, (16, 256), dtype=jnp.float32, minval=100.0, maxval=900.0
    ).astype(jnp.bfloat16)
    out_bf16 = jax.block_until_ready(cow_predictor(cw_bf16, m_param, b_param))
    ref_bf16 = (m_param * cw_bf16 + b_param * 1000.0).astype(jnp.bfloat16)
    assert out_bf16.dtype == jnp.bfloat16
    assert jnp.allclose(
        out_bf16.astype(jnp.float32), ref_bf16.astype(jnp.float32), rtol=1e-2, atol=1e-1
    )

    # --- Larger input: forces a multi-step grid (row tiling + double buffering).
    cw_big = jax.random.uniform(
        k2, (4096, 256), dtype=jnp.float32, minval=100.0, maxval=900.0
    )
    out_big = jax.block_until_ready(cow_predictor(cw_big, m_param, b_param))
    ref_big = m_param * cw_big + b_param * 1000.0
    assert jnp.allclose(out_big, ref_big, rtol=1e-6, atol=1e-6)

    print("KERNEL_OK")
</pallas_src>

<mosaic_0001>
module attributes {stable_mosaic.version = 11 : i64} {
  func.func @_cow_kernel(%arg0: i32, %arg1: memref<1x1xf32, #tpu.memory_space<smem>>, %arg2: memref<1x1xf32, #tpu.memory_space<smem>>, %arg3: memref<8x128xf32, #tpu.memory_space<vmem>>, %arg4: memref<8x128xf32, #tpu.memory_space<vmem>>) attributes {dimension_semantics = [#tpu.dimension_semantics<parallel>], iteration_bounds = array<i64: 1>, scalar_prefetch = 0 : i64, scratch_operands = 0 : i64, tpu.core_type = #tpu.core_type<tc>, window_params = [{transform_indices = @transform_0, window_bounds = array<i64: 1, 1>}, {transform_indices = @transform_1, window_bounds = array<i64: 1, 1>}, {transform_indices = @transform_2, window_bounds = array<i64: 8, 128>}, {transform_indices = @transform_3, window_bounds = array<i64: 8, 128>}]} {
    %c0 = arith.constant 0 : index
    %c0_0 = arith.constant 0 : index
    %0 = memref.load %arg1[%c0, %c0_0] : memref<1x1xf32, #tpu.memory_space<smem>>
    %c0_1 = arith.constant 0 : index
    %c0_2 = arith.constant 0 : index
    %1 = memref.load %arg2[%c0_1, %c0_2] : memref<1x1xf32, #tpu.memory_space<smem>>
    %c0_3 = arith.constant 0 : index
    %c0_4 = arith.constant 0 : index
    %2 = vector.load %arg3[%c0_3, %c0_4] : memref<8x128xf32, #tpu.memory_space<vmem>>, vector<8x128xf32>
    %3 = vector.broadcast %0 : f32 to vector<8x128xf32>
    %4 = arith.mulf %3, %2 : vector<8x128xf32>
    %5 = vector.broadcast %1 : f32 to vector<8x128xf32>
    %6 = arith.addf %4, %5 : vector<8x128xf32>
    %c0_5 = arith.constant 0 : index
    %c0_6 = arith.constant 0 : index
    %7 = vector.load %arg4[%c0_5, %c0_6] : memref<8x128xf32, #tpu.memory_space<vmem>>, vector<8x128xf32>
    tpu.vector_store %arg4[%c0_5, %c0_6], %6 {strides = array<i32>} : memref<8x128xf32, #tpu.memory_space<vmem>>, vector<8x128xf32>,
    return
  }
  func.func @transform_0(%arg0: i32) -> (i32, i32) {
    %c0_i32 = arith.constant 0 : i32
    %c0_i32_0 = arith.constant 0 : i32
    %c0_i32_1 = arith.constant 0 : i32
    return %c0_i32, %c0_i32_0 : i32, i32
  }
  func.func @transform_1(%arg0: i32) -> (i32, i32) {
    %c0_i32 = arith.constant 0 : i32
    %c0_i32_0 = arith.constant 0 : i32
    %c0_i32_1 = arith.constant 0 : i32
    return %c0_i32, %c0_i32_0 : i32, i32
  }
  func.func @transform_2(%arg0: i32) -> (i32, i32) {
    %c0_i32 = arith.constant 0 : i32
    %c0_i32_0 = arith.constant 0 : i32
    return %arg0, %c0_i32 : i32, i32
  }
  func.func @transform_3(%arg0: i32) -> (i32, i32) {
    %c0_i32 = arith.constant 0 : i32
    %c0_i32_0 = arith.constant 0 : i32
    return %arg0, %c0_i32 : i32, i32
  }
}

</mosaic_0001>

<bundles_post_ra>
// kernel: tpu_custom_call.1
= control target key start
LH: loop header
LB: loop body
LE: loop exit
PB: predicated region body
PF: predicated region fallthrough
CT: control target
= control target key end

     0   :  { %10 = vsyncpa [#allocation5], 0  ;;  %s154_s0 = inlined_call_operand.<no memory space> [shape: f32[1,1], index: 0, kind: input, shape index: {}]   ;;  %s155_s1 = inlined_call_operand.<no memory space> [shape: f32[1,1], index: 1, kind: input, shape index: {}]   ;;  %s156_s2 = inlined_call_operand.hbm [shape: f32[8,128], index: 2, kind: input, shape index: {}]   ;;  %s157_s3 = inlined_call_operand.hbm [shape: f32[8,128], index: 3, kind: output, shape index: {}]  }
   0x1   :  { %11 = vsyncpa [#allocation6], 0  ;;  %s102_s12 = smov [#allocation4]   ;;  %s54_s16 = scalar_lea.hbm %s156_s2, 128 }
   0x2   :  { %s22_s13 = sshll.u32 %s102_s12, 4  ;;  %p55_p0 = scmp.ne.s32.totalorder %s156_s2, %s54_s16  ;;  %s23_s13 = int_to_ptr.vmem [resolvable:$true] %s22_s13 }
   0x3   :  { %p58_p1 = scmp.lt.u32.totalorder %s54_s16, %s156_s2 }
   0x5   :  { %p60_p2 = pnand %p58_p1, %p55_p0 }
   0x7   :  { %63 = shalt.err (!%p60_p2)
}
   0x8   :  { %s64_s21 = scalar_lea.vmem %s23_s13, 128  ;;  %p69_p4 = scmp.lt.s32.totalorder %s23_s13, %s23_s13 }
   0x9   :  { %p65_p3 = scmp.ne.s32.totalorder %s23_s13, %s64_s21  ;;  %p70_p5 = scmp.lt.s32.totalorder %s64_s21, %s64_s21 }
   0xb   :  { %p71_p6 = por %p70_p5, %p69_p4 }
   0xd   :  { %p72_p7 = pnand %p71_p6, %p65_p3 }
   0xf   :  { %75 = shalt.err (!%p72_p7)
}
  0x10   :  { %25 = dma.hbm_to_vmem [thread:$0]  %s156_s2, 128, %s23_s13, [#allocation5]  }
  0x11   :  { %98 = dma.done.wait [#allocation5], 128  }
  0x12   :  { %99 = vsyncadd [#allocation5], 4294967168  ;;  %v32_v0 = vstv %s154_s0  ;;  %v31_v1 = vld [vmem:[#allocation4] sm:$0xff]  ;;  %v34_v2 = vstv %s155_s1  ;;  %s103_s28 = smov [#allocation7]  }
  0x13   :  { %s43_s29 = sshll.u32 %s103_s28, 4  ;;  %v33_v3 = vmul.f32 %v32_v0, %v31_v1  ;;  %s44_s29 = int_to_ptr.vmem [resolvable:$true] %s43_s29 }
  0x14   :  { %s76_s30 = scalar_lea.vmem %s44_s29, 128  ;;  %p81_p9 = scmp.lt.s32.totalorder %s44_s29, %s44_s29 }
  0x15   :  { %v35_v4 = vadd.f32 %v34_v2, %v33_v3  ;;  %p77_p8 = scmp.ne.s32.totalorder %s44_s29, %s76_s30  ;;  %p82_p10 = scmp.lt.s32.totalorder %s76_s30, %s76_s30 }
  0x17   :  { %36 = vst [vmem:[#allocation7] sm:$0xff] %v35_v4  ;;  %p83_p11 = por %p82_p10, %p81_p9 }
  0x19   :  { %p84_p12 = pnand %p83_p11, %p77_p8 }
  0x1b   :  { %87 = shalt.err (!%p84_p12)
}
  0x1c   :  { %s88_s4 = scalar_lea.hbm %s157_s3, 128 }
  0x1d   :  { %p89_p13 = scmp.ne.s32.totalorder %s157_s3, %s88_s4  ;;  %p92_p0 = scmp.lt.u32.totalorder %s88_s4, %s157_s3 }
  0x1f   :  { %p94_p1 = pnand %p92_p0, %p89_p13 }
  0x21   :  { %97 = shalt.err (!%p94_p1)
}
  0x22   :  { %46 = dma.vmem_to_hbm [thread:$0]  %s44_s29, 128, %s157_s3, [#allocation6]  }
  0x23   :  { %100 = dma.done.wait [#allocation6], 128  }
  0x24   :  { %101 = vsyncadd [#allocation6], 4294967168 }
  0x25   :  { %50 = vsyncpa [#allocation5], 1 }
  0x26   :  { %51 = vsyncpa [#allocation6], 1 }

</bundles_post_ra>
